<compile_context>
chip_gen: v7x
topology: tpu7x:2x2x1
jax: 0.10.0
libtpu: 0.0.40
codegen_flags: <defaults>
</compile_context>

<pallas_src>
import functools

import jax
import jax.numpy as jnp
from jax.experimental import pallas as pl
from jax.experimental.pallas import tpu as pltpu

EPS = 1e-5  # PyG InstanceNorm default eps


def adaptive_point_norm_kernel(
    x_ref,       # [N, C]  node features (aliased with output)
    style_ref,   # [N, S]  style vectors
    wagt_ref,    # [S, C]  affine weight, gamma half, pre-transposed
    bag_ref,     # [1, C]  affine bias, gamma half
    wabt_ref,    # [S, C]  affine weight, beta half, pre-transposed
    bab_ref,     # [1, C]  affine bias, beta half
    o_ref,       # [N, C]  output
):
    x = x_ref[...]
    s = style_ref[...]

    # ---- affine(style) -> gamma, beta (two lane-aligned MXU dots) ----
    gamma = jnp.dot(s, wagt_ref[...], preferred_element_type=jnp.float32) + bag_ref[...]
    beta = jnp.dot(s, wabt_ref[...], preferred_element_type=jnp.float32) + bab_ref[...]

    # ---- InstanceNorm over nodes (single graph), one-pass biased variance ----
    mean = jnp.mean(x, axis=0, keepdims=True)          # [1, C]
    mean2 = jnp.mean(x * x, axis=0, keepdims=True)     # [1, C]
    var = jnp.maximum(mean2 - mean * mean, 0.0)
    x_norm = (x - mean) * jax.lax.rsqrt(var + EPS)

    # ---- adaptive modulation ----
    o_ref[...] = gamma * x_norm + beta


def init_params(key, in_channels, style_dim):
    """Matches the PyTorch module's init: affine.weight ~ N(0,1), bias = [1]*C ++ [0]*C."""
    C, S = in_channels, style_dim
    wa = jax.random.normal(key, (2 * C, S), jnp.float32)   # nn.Linear(style_dim, 2C).weight
    ba = jnp.concatenate([jnp.ones((C,), jnp.float32), jnp.zeros((C,), jnp.float32)])
    return dict(wa=wa, ba=ba)


@functools.partial(jax.jit, donate_argnums=(0,))
def _run(x, style, wagt, bag, wabt, bab):
    N, C = x.shape
    vmem = pl.BlockSpec(memory_space=pltpu.MemorySpace.VMEM)
    return pl.pallas_call(
        adaptive_point_norm_kernel,
        out_shape=jax.ShapeDtypeStruct((N, C), jnp.float32),
        in_specs=[vmem] * 6,
        out_specs=vmem,
        input_output_aliases={0: 0},   # x fully consumed before the single output write
        compiler_params=pltpu.CompilerParams(vmem_limit_bytes=32 * 1024 * 1024),
    )(x, style, wagt, bag, wabt, bab)


def adaptive_point_norm(x, style, params):
    """x: [N, C] node features, style: [N, S] style vectors."""
    N, C = x.shape
    wa = params["wa"]                       # [2C, S]
    wagt = wa[:C, :].T                      # [S, C]  gamma half, pre-transposed
    wabt = wa[C:, :].T                      # [S, C]  beta half, pre-transposed
    bag = params["ba"][:C].reshape(1, C)
    bab = params["ba"][C:].reshape(1, C)
    return _run(x.astype(jnp.float32), style.astype(jnp.float32), wagt, bag, wabt, bab)


def _reference(x, style, params):
    """Pure-JAX reference of the PyTorch forward for a quick sanity check."""
    C = x.shape[1]
    s = style @ params["wa"].T + params["ba"]          # affine(style)  -> [N, 2C]
    gamma, beta = s[:, :C], s[:, C:]
    mean = jnp.mean(x, axis=0, keepdims=True)
    var = jnp.mean((x - mean) ** 2, axis=0, keepdims=True)
    out = (x - mean) / jnp.sqrt(var + EPS)
    return gamma * out + beta


if __name__ == "__main__":
    N, C, S = 64, 32, 16   # nodes, in_channels, style_dim
    key = jax.random.PRNGKey(0)
    k_x, k_style, k_param = jax.random.split(key, 3)

    x = jax.random.normal(k_x, (N, C), jnp.float32)
    style = jax.random.normal(k_style, (N, S), jnp.float32)
    params = init_params(k_param, C, S)

    ref = _reference(x, style, params)

    out = adaptive_point_norm(x, style, params)   # donates x
    out = jax.block_until_ready(out)

    assert out.shape == (N, C) and out.dtype == jnp.float32
    assert bool(jnp.all(jnp.isfinite(out)))
    assert bool(jnp.max(jnp.abs(out - ref)) < 1e-4)
    print("KERNEL_OK")
</pallas_src>

<mosaic_0001>
module attributes {stable_mosaic.version = 11 : i64} {
  func.func @adaptive_point_norm_kernel(%arg0: memref<64x32xf32, #tpu.memory_space<vmem>>, %arg1: memref<64x16xf32, #tpu.memory_space<vmem>>, %arg2: memref<16x32xf32, #tpu.memory_space<vmem>>, %arg3: memref<1x32xf32, #tpu.memory_space<vmem>>, %arg4: memref<16x32xf32, #tpu.memory_space<vmem>>, %arg5: memref<1x32xf32, #tpu.memory_space<vmem>>, %arg6: memref<64x32xf32, #tpu.memory_space<vmem>>) attributes {dimension_semantics = [], scalar_prefetch = 0 : i64, scratch_operands = 0 : i64, tpu.core_type = #tpu.core_type<tc>} {
    %c0 = arith.constant 0 : index
    %c0_0 = arith.constant 0 : index
    %0 = vector.load %arg0[%c0, %c0_0] : memref<64x32xf32, #tpu.memory_space<vmem>>, vector<64x32xf32>
    %c0_1 = arith.constant 0 : index
    %c0_2 = arith.constant 0 : index
    %1 = vector.load %arg1[%c0_1, %c0_2] : memref<64x16xf32, #tpu.memory_space<vmem>>, vector<64x16xf32>
    %c0_3 = arith.constant 0 : index
    %c0_4 = arith.constant 0 : index
    %2 = vector.load %arg2[%c0_3, %c0_4] : memref<16x32xf32, #tpu.memory_space<vmem>>, vector<16x32xf32>
    %cst = arith.constant dense<0.000000e+00> : vector<64x32xf32>
    %3 = tpu.matmul %1, %2, %cst {dimension_numbers = #tpu.dot_dimension_numbers<[1], [0], [0], [1], [0, 0, 1, 1], [], []>} : vector<64x16xf32>, vector<16x32xf32>, vector<64x32xf32> -> vector<64x32xf32>
    %c0_5 = arith.constant 0 : index
    %c0_6 = arith.constant 0 : index
    %4 = vector.load %arg3[%c0_5, %c0_6] : memref<1x32xf32, #tpu.memory_space<vmem>>, vector<1x32xf32>
    %5 = vector.broadcast %4 : vector<1x32xf32> to vector<64x32xf32>
    %6 = arith.addf %3, %5 : vector<64x32xf32>
    %c0_7 = arith.constant 0 : index
    %c0_8 = arith.constant 0 : index
    %7 = vector.load %arg4[%c0_7, %c0_8] : memref<16x32xf32, #tpu.memory_space<vmem>>, vector<16x32xf32>
    %cst_9 = arith.constant dense<0.000000e+00> : vector<64x32xf32>
    %8 = tpu.matmul %1, %7, %cst_9 {dimension_numbers = #tpu.dot_dimension_numbers<[1], [0], [0], [1], [0, 0, 1, 1], [], []>} : vector<64x16xf32>, vector<16x32xf32>, vector<64x32xf32> -> vector<64x32xf32>
    %c0_10 = arith.constant 0 : index
    %c0_11 = arith.constant 0 : index
    %9 = vector.load %arg5[%c0_10, %c0_11] : memref<1x32xf32, #tpu.memory_space<vmem>>, vector<1x32xf32>
    %10 = vector.broadcast %9 : vector<1x32xf32> to vector<64x32xf32>
    %11 = arith.addf %8, %10 : vector<64x32xf32>
    %cst_12 = arith.constant dense<0.000000e+00> : vector<32xf32>
    %12 = vector.multi_reduction <add>, %0, %cst_12 [0] : vector<64x32xf32> to vector<32xf32>
    %13 = vector.shape_cast %12 : vector<32xf32> to vector<1x32xf32>
    %cst_13 = arith.constant 6.400000e+01 : f32
    %14 = vector.broadcast %cst_13 : f32 to vector<1x32xf32>
    %15 = arith.divf %13, %14 : vector<1x32xf32>
    %16 = arith.mulf %0, %0 : vector<64x32xf32>
    %cst_14 = arith.constant dense<0.000000e+00> : vector<32xf32>
    %17 = vector.multi_reduction <add>, %16, %cst_14 [0] : vector<64x32xf32> to vector<32xf32>
    %18 = vector.shape_cast %17 : vector<32xf32> to vector<1x32xf32>
    %cst_15 = arith.constant 6.400000e+01 : f32
    %19 = vector.broadcast %cst_15 : f32 to vector<1x32xf32>
    %20 = arith.divf %18, %19 : vector<1x32xf32>
    %21 = arith.mulf %15, %15 : vector<1x32xf32>
    %22 = arith.subf %20, %21 : vector<1x32xf32>
    %cst_16 = arith.constant 0.000000e+00 : f32
    %23 = vector.broadcast %cst_16 : f32 to vector<1x32xf32>
    %24 = arith.maximumf %22, %23 : vector<1x32xf32>
    %25 = vector.broadcast %15 : vector<1x32xf32> to vector<64x32xf32>
    %26 = arith.subf %0, %25 : vector<64x32xf32>
    %cst_17 = arith.constant 9.99999974E-6 : f32
    %27 = vector.broadcast %cst_17 : f32 to vector<1x32xf32>
    %28 = arith.addf %24, %27 : vector<1x32xf32>
    %29 = math.rsqrt %28 : vector<1x32xf32>
    %30 = vector.broadcast %29 : vector<1x32xf32> to vector<64x32xf32>
    %31 = arith.mulf %26, %30 : vector<64x32xf32>
    %32 = arith.mulf %6, %31 : vector<64x32xf32>
    %33 = arith.addf %32, %11 : vector<64x32xf32>
    %c0_18 = arith.constant 0 : index
    %c0_19 = arith.constant 0 : index
    %34 = vector.load %arg6[%c0_18, %c0_19] : memref<64x32xf32, #tpu.memory_space<vmem>>, vector<64x32xf32>
    tpu.vector_store %arg6[%c0_18, %c0_19], %33 {strides = array<i32>} : memref<64x32xf32, #tpu.memory_space<vmem>>, vector<64x32xf32>,
    return
  }
}

</mosaic_0001>

<bundles_post_ra>
// kernel: _run.1
= control target key start
LH: loop header
LB: loop body
LE: loop exit
PB: predicated region body
PF: predicated region fallthrough
CT: control target
= control target key end

     0   :  { %vm48_vm0 = vcmask 130048   ;;  %vm292_vm1 = vcmask 261120   ;;  %s710_s2 = inlined_call_operand.vmem [shape: f32[16,32], index: 2, kind: input, shape index: {}]   ;;  %s711_s4 = inlined_call_operand.vmem [shape: f32[16,32], index: 4, kind: input, shape index: {}]   ;;  %s712_s1 = inlined_call_operand.vmem [shape: f32[64,16], index: 1, kind: input, shape index: {}]   ;;  %s713_s0 = inlined_call_operand.vmem [shape: f32[64,32], index: 0, kind: input, shape index: {}, may-alias: {0,6}]   ;;  %s714_s3 = inlined_call_operand.vmem [shape: f32[1,32], index: 3, kind: input, shape index: {}]   ;;  %s715_s5 = inlined_call_operand.vmem [shape: f32[1,32], index: 5, kind: input, shape index: {}]   ;;  %s716_s6 = inlined_call_operand.vmem [shape: f32[64,32], index: 6, kind: output, shape index: {}, may-alias: {0,6}]  }
   0x1   :  { %v39_v0 = vld [vmem:[%s710_s2] sm:$0xff]  ;;  %v40_v1 = vld [vmem:[%s710_s2 + $0x8] sm:$0xff]  ;;  %v33_v8 = vld [vmem:[%s712_s1 + $0x10] sm:$0xff] }
   0x2   :  { %v178_v2 = vld [vmem:[%s711_s4] sm:$0xff]  ;;  %v465_v3 = vpack.c.bf16 %v40_v1, %v39_v0  ;;  %v179_v4 = vld [vmem:[%s711_s4 + $0x8] sm:$0xff]  ;;  %v34_v9 = vld [vmem:[%s712_s1 + $0x18] sm:$0xff] }
   0x3   :  { %v31_v5 = vld [vmem:[%s712_s1] sm:$0xff]  ;;  %v469_v6 = vpack.c.bf16 %v179_v4, %v178_v2  ;;  %v32_v7 = vld [vmem:[%s712_s1 + $0x8] sm:$0xff]  ;;  %v37_v12 = vld [vmem:[%s712_s1 + $0x30] sm:$0xff] }
   0x4   :  { %437 = vmatprep.mubr.msk.f32.mxu0 %vm48_vm0, %v31_v5  ;;  %453 = vmatprep.mubr.msk.f32.mxu1 %vm48_vm0, %v31_v5  ;;  %v35_v10 = vld [vmem:[%s712_s1 + $0x20] sm:$0xff]  ;;  %v36_v11 = vld [vmem:[%s712_s1 + $0x28] sm:$0xff]  ;;  %v38_v13 = vld [vmem:[%s712_s1 + $0x38] sm:$0xff] }
   0x5   :  { %466 = vmatprep.subr.bf16.mxu0 %v465_v3  ;;  %470 = vmatprep.subr.bf16.mxu1 %v469_v6  ;;  %v565_v14 = vld [vmem:[%s713_s0] sm:$0xff]  ;;  %v570_v15 = vld [vmem:[%s713_s0 + $0x8] sm:$0xff]  ;;  %v583_v20 = vld [vmem:[%s713_s0 + $0x10] sm:$0xff] }
   0x6   :  { %468 = vmatpush3.bf16.msra.mxu0 %v465_v3  ;;  %472 = vmatpush3.bf16.msra.mxu1 %v469_v6  ;;  %v293_v16 = vsel %vm292_vm1, %v565_v14, 0.0  ;;  %v294_v17 = vsel %vm292_vm1, %v570_v15, 0.0  ;;  %v316_v18 = vmul.f32 %v565_v14, %v565_v14  ;;  %v317_v19 = vmul.f32 %v570_v15, %v570_v15  ;;  %v594_v26 = vld [vmem:[%s713_s0 + $0x18] sm:$0xff]  ;;  %v604_v32 = vld [vmem:[%s713_s0 + $0x20] sm:$0xff]  ;;  %v614_v38 = vld [vmem:[%s713_s0 + $0x28] sm:$0xff] }
   0x7   :  { %v295_v21 = vadd.f32 %v294_v17, %v293_v16  ;;  %v296_v22 = vsel %vm292_vm1, %v583_v20, 0.0  ;;  %v318_v23 = vmul.f32 %v583_v20, %v583_v20  ;;  %v298_v29 = vsel %vm292_vm1, %v594_v26, 0.0  ;;  %v624_v44 = vld [vmem:[%s713_s0 + $0x30] sm:$0xff]  ;;  %v634_v50 = vld [vmem:[%s713_s0 + $0x38] sm:$0xff] }
   0x8   :  { %v324_v24 = vsel %vm292_vm1, %v316_v18, 0.0  ;;  %v325_v25 = vsel %vm292_vm1, %v317_v19, 0.0  ;;  %v319_v30 = vmul.f32 %v594_v26, %v594_v26  ;;  %v300_v35 = vsel %vm292_vm1, %v604_v32, 0.0  ;;  %v395_v19 = vld [vmem:[%s714_s3] ss:$0 sm:$0xff] }
   0x9   :  { %438 = vmatmul.mubr.msk.f32.vlgmr.msra.gmra.mrb[0].mxu0 %vm48_vm0, %v32_v7  ;;  %454 = vmatmul.mubr.msk.f32.vlgmr.msra.gmra.mrb[0].mxu1 %vm48_vm0, %v32_v7  ;;  %v297_v27 = vadd.f32 %v296_v22, %v295_v21  ;;  %v326_v28 = vadd.f32 %v325_v25, %v324_v24  ;;  %v327_v31 = vsel %vm292_vm1, %v318_v23, 0.0  ;;  %v320_v36 = vmul.f32 %v604_v32, %v604_v32  ;;  %v656_v22 = vld [vmem:[%s715_s5] ss:$0 sm:$0xff] }
   0xa   :  { %440 = vmatprep.mubr.msk.f32.mxu0 %vm48_vm0, %v33_v8  ;;  %456 = vmatprep.mubr.msk.f32.mxu1 %vm48_vm0, %v33_v8  ;;  %v329_v37 = vsel %vm292_vm1, %v319_v30, 0.0  ;;  %v302_v41 = vsel %vm292_vm1, %v614_v38, 0.0  ;;  %v321_v42 = vmul.f32 %v614_v38, %v614_v38  ;;  %v304_v47 = vsel %vm292_vm1, %v624_v44, 0.0 }
   0xb   :  { %v299_v33 = vadd.f32 %v298_v29, %v297_v27  ;;  %v328_v34 = vadd.f32 %v327_v31, %v326_v28  ;;  %v331_v43 = vsel %vm292_vm1, %v320_v36, 0.0  ;;  %v322_v48 = vmul.f32 %v624_v44, %v624_v44 }
   0xc   :  { %v333_v49 = vsel %vm292_vm1, %v321_v42, 0.0  ;;  %v306_v53 = vsel %vm292_vm1, %v634_v50, 0.0  ;;  %v323_v54 = vmul.f32 %v634_v50, %v634_v50 }
   0xd   :  { %441 = vmatmul.mubr.msk.f32.gmra.mrb[2].mxu0 %vm48_vm0, %v34_v9  ;;  %457 = vmatmul.mubr.msk.f32.gmra.mrb[2].mxu1 %vm48_vm0, %v34_v9  ;;  %v301_v39 = vadd.f32 %v300_v35, %v299_v33  ;;  %v330_v40 = vadd.f32 %v329_v37, %v328_v34  ;;  %v335_v55 = vsel %vm292_vm1, %v322_v48, 0.0 }
   0xe   :  { %443 = vmatprep.mubr.msk.f32.mxu0 %vm48_vm0, %v35_v10  ;;  %459 = vmatprep.mubr.msk.f32.mxu1 %vm48_vm0, %v35_v10  ;;  %v337_v58 = vsel %vm292_vm1, %v323_v54, 0.0 }
   0xf   :  { %v303_v45 = vadd.f32 %v302_v41, %v301_v39  ;;  %v332_v46 = vadd.f32 %v331_v43, %v330_v40 }
  0x11   :  { %444 = vmatmul.mubr.msk.f32.gmra.mrb[4].mxu0 %vm48_vm0, %v36_v11  ;;  %460 = vmatmul.mubr.msk.f32.gmra.mrb[4].mxu1 %vm48_vm0, %v36_v11  ;;  %v305_v51 = vadd.f32 %v304_v47, %v303_v45  ;;  %v334_v52 = vadd.f32 %v333_v49, %v332_v46 }
  0x12   :  { %446 = vmatprep.mubr.msk.f32.mxu0 %vm48_vm0, %v37_v12  ;;  %462 = vmatprep.mubr.msk.f32.mxu1 %vm48_vm0, %v37_v12 }
  0x13   :  { %v307_v56 = vadd.f32 %v306_v53, %v305_v51  ;;  %v336_v57 = vadd.f32 %v335_v55, %v334_v52 }
  0x15   :  { %447 = vmatmul.mubr.msk.f32.gmra.mrb[6].mxu0 %vm48_vm0, %v38_v13  ;;  %463 = vmatmul.mubr.msk.f32.gmra.mrb[6].mxu1 %vm48_vm0, %v38_v13  ;;  %v308_v59 = vrot.slane %v307_v56, 4  ;;  %v338_v60 = vadd.f32 %v337_v58, %v336_v57 }
  0x17   :  { %v309_v61 = vadd.f32 %v308_v59, %v307_v56  ;;  %v339_v62 = vrot.slane %v338_v60, 4 }
  0x19   :  { %v310_v63 = vrot.slane %v309_v61, 2  ;;  %v340_v0 = vadd.f32 %v339_v62, %v338_v60 }
  0x1b   :  { %v311_v1 = vadd.f32 %v310_v63, %v309_v61  ;;  %v341_v2 = vrot.slane %v340_v0, 2 }
  0x1d   :  { %v312_v3 = vrot.slane %v311_v1, 1  ;;  %v342_v4 = vadd.f32 %v341_v2, %v340_v0 }
  0x1f   :  { %v313_v5 = vadd.f32 %v312_v3, %v311_v1  ;;  %v343_v6 = vrot.slane %v342_v4, 1 }
  0x21   :  { %v642_v7 = vmul.f32 0.015625, %v313_v5  ;;  %v344_v8 = vadd.f32 %v343_v6, %v342_v4 }
  0x23   :  { %v345_v9 = vmul.f32 0.015625, %v344_v8  ;;  %v346_v10 = vmul.f32 %v642_v7, %v642_v7  ;;  %v350_v16 = vsub.f32 %v570_v15, %v642_v7  ;;  %v349_v18 = vsub.f32 %v565_v14, %v642_v7 }
  0x24   :  { %v352_v23 = vsub.f32 %v594_v26, %v642_v7  ;;  %v351_v15 = vsub.f32 %v583_v20, %v642_v7  ;;  %v354_v36 = vsub.f32 %v614_v38, %v642_v7  ;;  %v353_v20 = vsub.f32 %v604_v32, %v642_v7 }
  0x25   :  { %v347_v11 = vsub.f32 %v345_v9, %v346_v10  ;;  %v356_v32 = vsub.f32 %v634_v50, %v642_v7  ;;  %v355_v55 = vsub.f32 %v624_v44, %v642_v7 }
  0x27   :  { %v348_v12 = vmax.f32 %v347_v11, 0.0 }
  0x29   :  { %v357_v13 = vadd.f32 1e-05, %v348_v12 }
  0x2b   :  { %473 = vrsqrt.f32 %v357_v13 }
  0x35   :  { %v474_v17 = vpop.eup %473 }
  0x36   :  { %v360_v21 = vmul.f32 %v474_v17, %v350_v16  ;;  %v359_v25 = vmul.f32 %v474_v17, %v349_v18  ;;  %v362_v35 = vmul.f32 %v474_v17, %v352_v23  ;;  %v361_v39 = vmul.f32 %v474_v17, %v351_v15 }
  0x37   :  { %v364_v51 = vmul.f32 %v474_v17, %v354_v36  ;;  %v363_v54 = vmul.f32 %v474_v17, %v353_v20  ;;  %v366_v1 = vmul.f32 %v474_v17, %v356_v32  ;;  %v365_v3 = vmul.f32 %v474_v17, %v355_v55 }
  0xdc   :  { %v439_v24 = vpop.f32.mrb[0].mxu0  ;;  %v455_v28 = vpop.f32.mrb[0].mxu1 }
  0xdd   :  { %v145_v27 = vadd.f32 %v439_v24, %v395_v19  ;;  %v139_v14 = vpop.f32.mrb[1].mxu0  ;;  %v259_v30 = vadd.f32 %v455_v28, %v656_v22  ;;  %v253_v31 = vpop.f32.mrb[1].mxu1 }
  0xde   :  { %v140_v29 = vadd.f32 %v395_v19, %v139_v14  ;;  %v254_v34 = vadd.f32 %v656_v22, %v253_v31 }
  0xdf   :  { %v368_v33 = vmul.f32 %v360_v21, %v145_v27 }
  0xe0   :  { %v367_v26 = vmul.f32 %v359_v25, %v140_v29  ;;  %v442_v37 = vpop.f32.mrb[2].mxu0  ;;  %v458_v43 = vpop.f32.mrb[2].mxu1 }
  0xe1   :  { %v376_v40 = vadd.f32 %v368_v33, %v259_v30  ;;  %v155_v41 = vadd.f32 %v442_v37, %v395_v19  ;;  %v149_v42 = vpop.f32.mrb[3].mxu0  ;;  %v269_v47 = vadd.f32 %v458_v43, %v656_v22  ;;  %v263_v48 = vpop.f32.mrb[3].mxu1 }
  0xe2   :  { %v375_v45 = vadd.f32 %v367_v26, %v254_v34  ;;  %v150_v46 = vadd.f32 %v395_v19, %v149_v42  ;;  %v264_v49 = vadd.f32 %v656_v22, %v263_v48 }
  0xe3   :  { %384 = vst.msk [vmem:[%s716_s6 + $0x8] sm:$0xff] %vm292_vm1, %v376_v40  ;;  %v370_v38 = vmul.f32 %v362_v35, %v155_v41 }
  0xe4   :  { %383 = vst.msk [vmem:[%s716_s6] sm:$0xff] %vm292_vm1, %v375_v45  ;;  %v369_v52 = vmul.f32 %v361_v39, %v150_v46  ;;  %v445_v53 = vpop.f32.mrb[4].mxu0  ;;  %v461_v59 = vpop.f32.mrb[4].mxu1 }
  0xe5   :  { %v378_v56 = vadd.f32 %v370_v38, %v269_v47  ;;  %v165_v57 = vadd.f32 %v445_v53, %v395_v19  ;;  %v159_v58 = vpop.f32.mrb[5].mxu0  ;;  %v279_v62 = vadd.f32 %v461_v59, %v656_v22  ;;  %v273_v50 = vpop.f32.mrb[5].mxu1 }
  0xe6   :  { %v377_v60 = vadd.f32 %v369_v52, %v264_v49  ;;  %v160_v61 = vadd.f32 %v395_v19, %v159_v58  ;;  %v274_v0 = vadd.f32 %v656_v22, %v273_v50 }
  0xe7   :  { %386 = vst.msk [vmem:[%s716_s6 + $0x18] sm:$0xff] %vm292_vm1, %v378_v56  ;;  %v372_v63 = vmul.f32 %v364_v51, %v165_v57 }
  0xe8   :  { %385 = vst.msk [vmem:[%s716_s6 + $0x10] sm:$0xff] %vm292_vm1, %v377_v60  ;;  %v371_v44 = vmul.f32 %v363_v54, %v160_v61  ;;  %v448_v2 = vpop.f32.mrb[6].mxu0  ;;  %v464_v7 = vpop.f32.mrb[6].mxu1 }
  0xe9   :  { %v380_v4 = vadd.f32 %v372_v63, %v279_v62  ;;  %v175_v5 = vadd.f32 %v448_v2, %v395_v19  ;;  %v169_v6 = vpop.f32.mrb[7].mxu0  ;;  %v289_v10 = vadd.f32 %v464_v7, %v656_v22  ;;  %v283_v11 = vpop.f32.mrb[7].mxu1 }
  0xea   :  { %v379_v8 = vadd.f32 %v371_v44, %v274_v0  ;;  %v170_v9 = vadd.f32 %v395_v19, %v169_v6  ;;  %v284_v13 = vadd.f32 %v656_v22, %v283_v11 }
  0xeb   :  { %388 = vst.msk [vmem:[%s716_s6 + $0x28] sm:$0xff] %vm292_vm1, %v380_v4  ;;  %v374_v12 = vmul.f32 %v366_v1, %v175_v5 }
  0xec   :  { %387 = vst.msk [vmem:[%s716_s6 + $0x20] sm:$0xff] %vm292_vm1, %v379_v8  ;;  %v373_v16 = vmul.f32 %v365_v3, %v170_v9 }
  0xed   :  { %v382_v17 = vadd.f32 %v374_v12, %v289_v10 }
  0xee   :  { %v381_v18 = vadd.f32 %v373_v16, %v284_v13 }
  0xef   :  { %390 = vst.msk [vmem:[%s716_s6 + $0x38] sm:$0xff] %vm292_vm1, %v382_v17 }
  0xf0   :  { %389 = vst.msk [vmem:[%s716_s6 + $0x30] sm:$0xff] %vm292_vm1, %v381_v18 }

</bundles_post_ra>
